<compile_context>
chip_gen: v5e
topology: v5e:2x2
jax: 0.10.0
libtpu: 0.0.40
codegen_flags: <defaults>
</compile_context>

<pallas_src>
import jax
import jax.numpy as jnp
from jax.experimental import pallas as pl
from jax.experimental.pallas import tpu as pltpu

_LANES = 128


def _pos_embed_kernel(w_ref, o_ref, sem):
    # w_ref: (tile_rows, 128) VMEM slab of the position-embedding table
    #        (auto-pipelined: fetched from HBM once per grid step, double-buffered).
    # o_ref: (batch, total_rows, 128) full output, left in HBM (pl.ANY).
    # sem:   (1,) DMA semaphore shared by the `batch` replication copies.
    tile_rows = w_ref.shape[0]
    batch = o_ref.shape[0]
    start = pl.program_id(0) * tile_rows
    # Replicate the VMEM-resident weight slab into every batch row of the output.
    for b in range(batch):
        pltpu.make_async_copy(
            w_ref, o_ref.at[b, pl.ds(start, tile_rows), :], sem.at[0]).start()
    # All copies are identical in size, so waiting `batch` times on the shared
    # semaphore consumes exactly the signals produced, in any completion order.
    for b in range(batch):
        pltpu.make_async_copy(
            w_ref, o_ref.at[b, pl.ds(start, tile_rows), :], sem.at[0]).wait()


def _vmem_plan():
    """Return (vmem_limit_bytes, weight double-buffer budget) per generation."""
    limit = 32 << 20  # safe everywhere (== default scoped VMEM on v7x)
    try:
        phys = pltpu.get_tpu_info().vmem_capacity_bytes
        if phys >= (96 << 20):  # v5e / v6e: 128 MiB physical VMEM per core
            limit = 64 << 20
    except Exception:
        pass
    return limit, (limit * 3) // 4  # leave headroom for pipeline internals


def _choose_tile_rows(total_rows, batch, itemsize, sublane, budget):
    """Largest divisor of total_rows giving sublane-dense, VMEM-fitting slabs."""
    valid = []
    for t in range(total_rows, 0, -1):
        if total_rows % t:
            continue
        # (8,128) rule: block rows must be a multiple of the sublane tile, or
        # the block must span the whole (reshaped) array.
        if t % sublane != 0 and t != total_rows:
            continue
        # Padding-exact VMEM estimate: only the double-buffered weight slab
        # lives in VMEM (output never enters VMEM).
        if 2 * t * _LANES * itemsize > budget:
            continue
        valid.append(t)  # descending order
    if not valid:
        return None
    # Prefer an even number (>=2) of grid steps -- v7x has two TensorCores --
    # gated on the per-step OUTPUT writeback staying large (>= 2 MiB).
    for t in valid:
        steps = total_rows // t
        if steps >= 2 and steps % 2 == 0 and batch * t * _LANES * itemsize >= (2 << 20):
            return t
    return valid[0]


def position_embedding(input_ids, weight, *, min_pallas_bytes=4 << 20,
                       force_pallas=False):
    """out[b, s, :] = weight[s, :]; input_ids values ignored (shape only)."""
    batch, seq_len = input_ids.shape
    max_positions, d_model = weight.shape
    assert seq_len <= max_positions

    itemsize = jnp.dtype(weight.dtype).itemsize
    out_bytes = batch * seq_len * d_model * itemsize

    def xla_fallback():
        return jnp.broadcast_to(weight[:seq_len][None], (batch, seq_len, d_model))

    # TODO(synk): the real win for this zero-FLOP op is fusing it with the token
    # embedding add in one pass; standalone it can at best tie XLA's broadcast.
    if not force_pallas and out_bytes < min_pallas_bytes:
        return xla_fallback()

    flat = seq_len * d_model
    if flat % _LANES != 0:
        # No lane-dense decomposition of the flattened slab: keep semantics via XLA.
        return xla_fallback()
    total_rows = flat // _LANES
    sublane = max(1, 32 // itemsize)  # 8 for f32, 16 for bf16, 32 for int8/fp8

    vmem_limit, budget = _vmem_plan()
    tile_rows = _choose_tile_rows(total_rows, batch, itemsize, sublane, budget)
    if tile_rows is None:
        return xla_fallback()

    # Row-major contiguous reshape: free layout plumbing, no data movement.
    w_used = weight if seq_len == max_positions else weight[:seq_len]
    w2d = w_used.reshape(total_rows, _LANES)

    out3d = pl.pallas_call(
        _pos_embed_kernel,
        out_shape=jax.ShapeDtypeStruct((batch, total_rows, _LANES), weight.dtype),
        grid_spec=pltpu.PrefetchScalarGridSpec(
            num_scalar_prefetch=0,
            grid=(total_rows // tile_rows,),
            in_specs=[
                # Each weight slab is DMA'd HBM->VMEM exactly once, double-buffered.
                pl.BlockSpec((tile_rows, _LANES), lambda j: (j, 0)),
            ],
            # Output never enters VMEM: the kernel DMA-replicates straight to HBM.
            out_specs=pl.BlockSpec(memory_space=pl.ANY),
            scratch_shapes=[pltpu.SemaphoreType.DMA((1,))],
        ),
        compiler_params=pltpu.CompilerParams(
            dimension_semantics=("parallel",),
            vmem_limit_bytes=vmem_limit,
        ),
    )(w2d)
    return out3d.reshape(batch, seq_len, d_model)


if __name__ == "__main__":
    # Small shapes consistent with the module: batch=2, seq=8, d_model=32.
    batch, seq_len = 2, 8
    max_positions, d_model = 16, 32

    key = jax.random.PRNGKey(0)
    k_w, k_ids = jax.random.split(key)

    # Deterministic parameter init matching nn.init.normal_(std=0.02).
    weight = 0.02 * jax.random.normal(k_w, (max_positions, d_model), dtype=jnp.float32)

    # input_ids values are irrelevant to the forward, but construct them anyway.
    input_ids = jax.random.randint(k_ids, (batch, seq_len), 0, 100, dtype=jnp.int32)

    # Reference: out[b, s] == weight[s]
    ref = jnp.broadcast_to(weight[:seq_len][None], (batch, seq_len, d_model))

    # Force the Pallas path so the kernel itself is exercised at this tiny size.
    out = position_embedding(input_ids, weight, force_pallas=True)
    out = jax.block_until_ready(out)
    assert out.shape == (batch, seq_len, d_model)
    assert jnp.allclose(out, ref), "pallas kernel mismatch vs. reference"

    # Also sanity-check the tiny-shape XLA fallback path keeps identical semantics.
    out_fb = jax.block_until_ready(position_embedding(input_ids, weight))
    assert jnp.allclose(out_fb, ref), "fallback mismatch vs. reference"

    print("KERNEL_OK")
</pallas_src>

<mosaic_0001>
module attributes {stable_mosaic.version = 11 : i64} {
  func.func @_pos_embed_kernel(%arg0: i32, %arg1: memref<2x128xf32, #tpu.memory_space<vmem>>, %arg2: memref<2x2x128xf32, #tpu.memory_space<any>>, %arg3: memref<1x!tpu.dma_semaphore, #tpu.memory_space<semaphore_mem>>) attributes {dimension_semantics = [#tpu.dimension_semantics<parallel>], iteration_bounds = array<i64: 1>, scalar_prefetch = 0 : i64, scratch_operands = 1 : i64, tpu.core_type = #tpu.core_type<tc>, window_params = [{transform_indices = @transform_0, window_bounds = array<i64: 2, 128>}, {}]} {
    %c2_i32 = arith.constant 2 : i32
    %0 = arith.muli %arg0, %c2_i32 : i32
    %c0_i32 = arith.constant 0 : i32
    %c0_i32_0 = arith.constant 0 : i32
    %c0_i32_1 = arith.constant 0 : i32
    %1 = tpu.memref_slice %arg2[%c0_i32, %0, %c0_i32_1] : memref<2x2x128xf32, #tpu.memory_space<any>> -> memref<1x2x128xf32, #tpu.memory_space<any>>
    %2 = tpu.memref_squeeze %1 : memref<1x2x128xf32, #tpu.memory_space<any>> -> memref<2x128xf32, #tpu.memory_space<any>>
    %3 = tpu.memref_slice %arg3[%c0_i32_0] : memref<1x!tpu.dma_semaphore, #tpu.memory_space<semaphore_mem>> -> memref<1x!tpu.dma_semaphore, #tpu.memory_space<semaphore_mem>>
    %4 = tpu.memref_squeeze %3 : memref<1x!tpu.dma_semaphore, #tpu.memory_space<semaphore_mem>> -> memref<!tpu.dma_semaphore, #tpu.memory_space<semaphore_mem>>
    tpu.enqueue_dma source(%arg1 : memref<2x128xf32, #tpu.memory_space<vmem>>) target(%2 : memref<2x128xf32, #tpu.memory_space<any>>) target_semaphore(%4 : memref<!tpu.dma_semaphore, #tpu.memory_space<semaphore_mem>>)
    %c1_i32 = arith.constant 1 : i32
    %c0_i32_2 = arith.constant 0 : i32
    %c0_i32_3 = arith.constant 0 : i32
    %5 = tpu.memref_slice %arg2[%c1_i32, %0, %c0_i32_3] : memref<2x2x128xf32, #tpu.memory_space<any>> -> memref<1x2x128xf32, #tpu.memory_space<any>>
    %6 = tpu.memref_squeeze %5 : memref<1x2x128xf32, #tpu.memory_space<any>> -> memref<2x128xf32, #tpu.memory_space<any>>
    %7 = tpu.memref_slice %arg3[%c0_i32_2] : memref<1x!tpu.dma_semaphore, #tpu.memory_space<semaphore_mem>> -> memref<1x!tpu.dma_semaphore, #tpu.memory_space<semaphore_mem>>
    %8 = tpu.memref_squeeze %7 : memref<1x!tpu.dma_semaphore, #tpu.memory_space<semaphore_mem>> -> memref<!tpu.dma_semaphore, #tpu.memory_space<semaphore_mem>>
    tpu.enqueue_dma source(%arg1 : memref<2x128xf32, #tpu.memory_space<vmem>>) target(%6 : memref<2x128xf32, #tpu.memory_space<any>>) target_semaphore(%8 : memref<!tpu.dma_semaphore, #tpu.memory_space<semaphore_mem>>)
    %c0_i32_4 = arith.constant 0 : i32
    %c0_i32_5 = arith.constant 0 : i32
    %c0_i32_6 = arith.constant 0 : i32
    %9 = tpu.memref_slice %arg2[%c0_i32_4, %0, %c0_i32_6] : memref<2x2x128xf32, #tpu.memory_space<any>> -> memref<1x2x128xf32, #tpu.memory_space<any>>
    %10 = tpu.memref_squeeze %9 : memref<1x2x128xf32, #tpu.memory_space<any>> -> memref<2x128xf32, #tpu.memory_space<any>>
    %11 = tpu.memref_slice %arg3[%c0_i32_5] : memref<1x!tpu.dma_semaphore, #tpu.memory_space<semaphore_mem>> -> memref<1x!tpu.dma_semaphore, #tpu.memory_space<semaphore_mem>>
    %12 = tpu.memref_squeeze %11 : memref<1x!tpu.dma_semaphore, #tpu.memory_space<semaphore_mem>> -> memref<!tpu.dma_semaphore, #tpu.memory_space<semaphore_mem>>
    tpu.wait_dma2 semaphore(%12 : memref<!tpu.dma_semaphore, #tpu.memory_space<semaphore_mem>>) src(%arg1 : memref<2x128xf32, #tpu.memory_space<vmem>>) dst(%10 : memref<2x128xf32, #tpu.memory_space<any>>)
    %c1_i32_7 = arith.constant 1 : i32
    %c0_i32_8 = arith.constant 0 : i32
    %c0_i32_9 = arith.constant 0 : i32
    %13 = tpu.memref_slice %arg2[%c1_i32_7, %0, %c0_i32_9] : memref<2x2x128xf32, #tpu.memory_space<any>> -> memref<1x2x128xf32, #tpu.memory_space<any>>
    %14 = tpu.memref_squeeze %13 : memref<1x2x128xf32, #tpu.memory_space<any>> -> memref<2x128xf32, #tpu.memory_space<any>>
    %15 = tpu.memref_slice %arg3[%c0_i32_8] : memref<1x!tpu.dma_semaphore, #tpu.memory_space<semaphore_mem>> -> memref<1x!tpu.dma_semaphore, #tpu.memory_space<semaphore_mem>>
    %16 = tpu.memref_squeeze %15 : memref<1x!tpu.dma_semaphore, #tpu.memory_space<semaphore_mem>> -> memref<!tpu.dma_semaphore, #tpu.memory_space<semaphore_mem>>
    tpu.wait_dma2 semaphore(%16 : memref<!tpu.dma_semaphore, #tpu.memory_space<semaphore_mem>>) src(%arg1 : memref<2x128xf32, #tpu.memory_space<vmem>>) dst(%14 : memref<2x128xf32, #tpu.memory_space<any>>)
    return
  }
  func.func @transform_0(%arg0: i32) -> (i32, i32) {
    %c0_i32 = arith.constant 0 : i32
    %c0_i32_0 = arith.constant 0 : i32
    return %arg0, %c0_i32 : i32, i32
  }
}

</mosaic_0001>

<bundles_post_ra>
// kernel: tpu_custom_call.1
= control target key start
LH: loop header
LB: loop body
LE: loop exit
PB: predicated region body
PF: predicated region fallthrough
CT: control target
= control target key end

     0   :  { %6 = vsyncpa [#allocation4], 0  ;;  %s143_s9 = smov [#allocation3]   ;;  %s163_s0 = inlined_call_operand.hbm [shape: f32[2,128], index: 0, kind: input, shape index: {}]   ;;  %s164_s1 = inlined_call_operand.hbm [shape: f32[2,2,128], index: 1, kind: output, shape index: {}]  }
   0x1   :  { %s12_s8 = sshll.u32 %s163_s0, 4  ;;  %s14_s10 = sshll.u32 %s143_s9, 4  ;;  %s13_s8 = int_to_ptr.hbm [resolvable:$true] %s12_s8  ;;  %s15_s10 = int_to_ptr.vmem [resolvable:$true] %s14_s10 }
   0x2   :  { %17 = dma.hbm_to_vmem [thread:$0]  %s13_s8, 32, %s15_s10, [#allocation4]  }
   0x3   :  { %139 = dma.done.wait [#allocation4], 32  }
   0x4   :  { %140 = vsyncadd [#allocation4], 4294967264  ;;  %s33_s13 = sshll.u32 %s164_s1, 4  ;;  %s64_s16 = scalar_lea.hbm %s164_s1, 2  ;;  %s34_s13 = int_to_ptr.hbm [resolvable:$true] %s33_s13 }
   0x5   :  { %s48_s17 = sshll.u32 %s64_s16, 4  ;;  %s49_s17 = int_to_ptr.hbm [resolvable:$true] %s48_s17 }
   0x6   :  { %36 = dma.vmem_to_hbm [thread:$0]  %s15_s10, 32, %s34_s13, [#allocation2] }
   0x7   :  { %51 = dma.vmem_to_hbm [thread:$0]  %s15_s10, 32, %s49_s17, [#allocation2] }
   0x8   :  { %141 = dma.done.wait [#allocation2], 64 }
   0x9   :  { %142 = vsyncadd [#allocation2], 4294967232 }
   0xa   :  { %57 = vsyncpa [#allocation4], 1 }
   0xb   :  { %58 = vsyncmov [#allocation2] }
   0xe   :  { %s59_s0 = vpop.sfrf %58 }
   0xf   :  { %p65_p0 = scmp.ne.s32.totalorder %s59_s0, 0 }
  0x11   :  { %63 = shalt.err (%p65_p0)  }

</bundles_post_ra>
